<compile_context>
chip_gen: v7x
topology: tpu7x:2x2x1
jax: 0.10.0
libtpu: 0.0.40
codegen_flags: <defaults>
</compile_context>

<pallas_src>
import functools

import jax
import jax.numpy as jnp
from jax.experimental import pallas as pl
from jax.experimental.pallas import tpu as pltpu

STATE_SIZE = 7
ACTION_SIZE = 15
HIDDEN_SIZE = 128

STATE_PAD = 8      # fc1 K dim padded 7 -> 8
OUT_PAD = 128      # fc3 output padded 15 -> 128 (lane-dense stores)
MAX_TB = 512       # max batch tile per grid step


def _round_up(n, m):
    return ((n + m - 1) // m) * m


def dqn_kernel(x_ref, w1_ref, b1_ref, w2_ref, b2_ref, w3_ref, b3_ref, o_ref):
    # fc1 + relu
    h1 = jnp.dot(x_ref[...], w1_ref[...],
                 preferred_element_type=jnp.float32) + b1_ref[...]
    h1 = jnp.maximum(h1, 0.0)
    # fc2 + relu
    h2 = jnp.dot(h1, w2_ref[...],
                 preferred_element_type=jnp.float32) + b2_ref[...]
    h2 = jnp.maximum(h2, 0.0)
    # fc3 (no activation); lane-dense (TB, 128) store
    o_ref[...] = jnp.dot(h2, w3_ref[...],
                         preferred_element_type=jnp.float32) + b3_ref[...]


def init_params(key):
    """f32 params mimicking PyTorch nn.Linear init; weights stored (in, out)."""
    def linear(key, fan_in, fan_out):
        kw, kb = jax.random.split(key)
        bound = 1.0 / jnp.sqrt(jnp.float32(fan_in))
        w = jax.random.uniform(kw, (fan_in, fan_out), jnp.float32, -bound, bound)
        b = jax.random.uniform(kb, (1, fan_out), jnp.float32, -bound, bound)
        return w, b

    k1, k2, k3 = jax.random.split(key, 3)
    w1, b1 = linear(k1, STATE_SIZE, HIDDEN_SIZE)
    w2, b2 = linear(k2, HIDDEN_SIZE, HIDDEN_SIZE)
    w3, b3 = linear(k3, HIDDEN_SIZE, ACTION_SIZE)
    return dict(w1=w1, b1=b1, w2=w2, b2=b2, w3=w3, b3=b3)


def pack_params(p):
    """Pad params to MXU/lane-friendly shapes (all f32)."""
    w1 = jnp.zeros((STATE_PAD, HIDDEN_SIZE), jnp.float32).at[:STATE_SIZE].set(p["w1"])
    w3 = jnp.zeros((HIDDEN_SIZE, OUT_PAD), jnp.float32).at[:, :ACTION_SIZE].set(p["w3"])
    b3 = jnp.zeros((1, OUT_PAD), jnp.float32).at[:, :ACTION_SIZE].set(p["b3"])
    return dict(w1=w1, b1=p["b1"], w2=p["w2"], b2=p["b2"], w3=w3, b3=b3)


@functools.partial(jax.jit, static_argnames=("max_tb",))
def dqn_forward(x, packed, *, max_tb=MAX_TB):
    """x: (B, STATE_SIZE) f32. packed: output of pack_params. Returns (B, 15) f32."""
    B = x.shape[0]
    # Batch tile: multiple of 8 (f32 sublane grain), capped at max_tb.
    TB = min(max_tb, _round_up(B, 8))
    B_pad = _round_up(B, TB)

    x_p = jnp.zeros((B_pad, STATE_PAD), jnp.float32)
    x_p = x_p.at[:B, :STATE_SIZE].set(x.astype(jnp.float32))

    w1, b1 = packed["w1"], packed["b1"]
    w2, b2 = packed["w2"], packed["b2"]
    w3, b3 = packed["w3"], packed["b3"]

    # Weights/biases: full-array block, same block index every grid step ->
    # resident in VMEM across the whole grid (DMA'd once).
    def resident(a):
        return pl.BlockSpec(a.shape, lambda i: (0,) * a.ndim)

    out = pl.pallas_call(
        dqn_kernel,
        out_shape=jax.ShapeDtypeStruct((B_pad, OUT_PAD), jnp.float32),
        grid=(B_pad // TB,),
        in_specs=[
            pl.BlockSpec((TB, STATE_PAD), lambda i: (i, 0)),
            resident(w1), resident(b1),
            resident(w2), resident(b2),
            resident(w3), resident(b3),
        ],
        out_specs=pl.BlockSpec((TB, OUT_PAD), lambda i: (i, 0)),
        compiler_params=pltpu.CompilerParams(
            dimension_semantics=("parallel",),  # megacore sharding where available
        ),
    )(x_p, w1, b1, w2, b2, w3, b3)

    return out[:B, :ACTION_SIZE]


def dqn_reference(x, p):
    """Pure-JAX f32 reference matching the PyTorch forward."""
    h1 = jnp.maximum(x @ p["w1"] + p["b1"], 0.0)
    h2 = jnp.maximum(h1 @ p["w2"] + p["b2"], 0.0)
    return h2 @ p["w3"] + p["b3"]


if __name__ == "__main__":
    key = jax.random.PRNGKey(0)
    kp, kx = jax.random.split(key)

    params = init_params(kp)
    packed = pack_params(params)

    batch = 8
    x = jax.random.normal(kx, (batch, STATE_SIZE), jnp.float32)

    out = dqn_forward(x, packed)
    out = jax.block_until_ready(out)

    ref = dqn_reference(x, params)
    assert out.shape == (batch, ACTION_SIZE), out.shape
    # MXU f32 matmuls may use multi-pass bf16 accumulation -> modest tolerance.
    assert jnp.allclose(out, ref, atol=1e-2, rtol=1e-2), "mismatch vs reference"

    print("KERNEL_OK")
</pallas_src>

<mosaic_0001>
module attributes {stable_mosaic.version = 11 : i64} {
  func.func @dqn_kernel(%arg0: i32, %arg1: memref<8x8xf32, #tpu.memory_space<vmem>>, %arg2: memref<8x128xf32, #tpu.memory_space<vmem>>, %arg3: memref<1x128xf32, #tpu.memory_space<vmem>>, %arg4: memref<128x128xf32, #tpu.memory_space<vmem>>, %arg5: memref<1x128xf32, #tpu.memory_space<vmem>>, %arg6: memref<128x128xf32, #tpu.memory_space<vmem>>, %arg7: memref<1x128xf32, #tpu.memory_space<vmem>>, %arg8: memref<8x128xf32, #tpu.memory_space<vmem>>) attributes {dimension_semantics = [#tpu.dimension_semantics<parallel>], iteration_bounds = array<i64: 1>, scalar_prefetch = 0 : i64, scratch_operands = 0 : i64, tpu.core_type = #tpu.core_type<tc>, window_params = [{transform_indices = @transform_0, window_bounds = array<i64: 8, 8>}, {pipeline_mode = #tpu.pipeline_mode<synchronous>, transform_indices = @transform_1, window_bounds = array<i64: 8, 128>}, {pipeline_mode = #tpu.pipeline_mode<synchronous>, transform_indices = @transform_2, window_bounds = array<i64: 1, 128>}, {pipeline_mode = #tpu.pipeline_mode<synchronous>, transform_indices = @transform_3, window_bounds = array<i64: 128, 128>}, {pipeline_mode = #tpu.pipeline_mode<synchronous>, transform_indices = @transform_4, window_bounds = array<i64: 1, 128>}, {pipeline_mode = #tpu.pipeline_mode<synchronous>, transform_indices = @transform_5, window_bounds = array<i64: 128, 128>}, {pipeline_mode = #tpu.pipeline_mode<synchronous>, transform_indices = @transform_6, window_bounds = array<i64: 1, 128>}, {transform_indices = @transform_7, window_bounds = array<i64: 8, 128>}]} {
    %c0 = arith.constant 0 : index
    %c0_0 = arith.constant 0 : index
    %0 = vector.load %arg1[%c0, %c0_0] : memref<8x8xf32, #tpu.memory_space<vmem>>, vector<8x8xf32>
    %c0_1 = arith.constant 0 : index
    %c0_2 = arith.constant 0 : index
    %1 = vector.load %arg2[%c0_1, %c0_2] : memref<8x128xf32, #tpu.memory_space<vmem>>, vector<8x128xf32>
    %cst = arith.constant dense<0.000000e+00> : vector<8x128xf32>
    %2 = tpu.matmul %0, %1, %cst {dimension_numbers = #tpu.dot_dimension_numbers<[1], [0], [0], [1], [0, 0, 1, 1], [], []>} : vector<8x8xf32>, vector<8x128xf32>, vector<8x128xf32> -> vector<8x128xf32>
    %c0_3 = arith.constant 0 : index
    %c0_4 = arith.constant 0 : index
    %3 = vector.load %arg3[%c0_3, %c0_4] : memref<1x128xf32, #tpu.memory_space<vmem>>, vector<1x128xf32>
    %4 = vector.broadcast %3 : vector<1x128xf32> to vector<8x128xf32>
    %5 = arith.addf %2, %4 : vector<8x128xf32>
    %cst_5 = arith.constant 0.000000e+00 : f32
    %6 = vector.broadcast %cst_5 : f32 to vector<8x128xf32>
    %7 = arith.maximumf %5, %6 : vector<8x128xf32>
    %c0_6 = arith.constant 0 : index
    %c0_7 = arith.constant 0 : index
    %8 = vector.load %arg4[%c0_6, %c0_7] : memref<128x128xf32, #tpu.memory_space<vmem>>, vector<128x128xf32>
    %cst_8 = arith.constant dense<0.000000e+00> : vector<8x128xf32>
    %9 = tpu.matmul %7, %8, %cst_8 {dimension_numbers = #tpu.dot_dimension_numbers<[1], [0], [0], [1], [0, 0, 1, 1], [], []>} : vector<8x128xf32>, vector<128x128xf32>, vector<8x128xf32> -> vector<8x128xf32>
    %c0_9 = arith.constant 0 : index
    %c0_10 = arith.constant 0 : index
    %10 = vector.load %arg5[%c0_9, %c0_10] : memref<1x128xf32, #tpu.memory_space<vmem>>, vector<1x128xf32>
    %11 = vector.broadcast %10 : vector<1x128xf32> to vector<8x128xf32>
    %12 = arith.addf %9, %11 : vector<8x128xf32>
    %cst_11 = arith.constant 0.000000e+00 : f32
    %13 = vector.broadcast %cst_11 : f32 to vector<8x128xf32>
    %14 = arith.maximumf %12, %13 : vector<8x128xf32>
    %c0_12 = arith.constant 0 : index
    %c0_13 = arith.constant 0 : index
    %15 = vector.load %arg6[%c0_12, %c0_13] : memref<128x128xf32, #tpu.memory_space<vmem>>, vector<128x128xf32>
    %cst_14 = arith.constant dense<0.000000e+00> : vector<8x128xf32>
    %16 = tpu.matmul %14, %15, %cst_14 {dimension_numbers = #tpu.dot_dimension_numbers<[1], [0], [0], [1], [0, 0, 1, 1], [], []>} : vector<8x128xf32>, vector<128x128xf32>, vector<8x128xf32> -> vector<8x128xf32>
    %c0_15 = arith.constant 0 : index
    %c0_16 = arith.constant 0 : index
    %17 = vector.load %arg7[%c0_15, %c0_16] : memref<1x128xf32, #tpu.memory_space<vmem>>, vector<1x128xf32>
    %18 = vector.broadcast %17 : vector<1x128xf32> to vector<8x128xf32>
    %19 = arith.addf %16, %18 : vector<8x128xf32>
    %c0_17 = arith.constant 0 : index
    %c0_18 = arith.constant 0 : index
    %20 = vector.load %arg8[%c0_17, %c0_18] : memref<8x128xf32, #tpu.memory_space<vmem>>, vector<8x128xf32>
    tpu.vector_store %arg8[%c0_17, %c0_18], %19 {strides = array<i32>} : memref<8x128xf32, #tpu.memory_space<vmem>>, vector<8x128xf32>,
    return
  }
  func.func @transform_0(%arg0: i32) -> (i32, i32) {
    %c0_i32 = arith.constant 0 : i32
    %c0_i32_0 = arith.constant 0 : i32
    return %arg0, %c0_i32 : i32, i32
  }
  func.func @transform_1(%arg0: i32) -> (i32, i32) {
    %c0_i32 = arith.constant 0 : i32
    %c0_i32_0 = arith.constant 0 : i32
    %c0_i32_1 = arith.constant 0 : i32
    return %c0_i32, %c0_i32_0 : i32, i32
  }
  func.func @transform_2(%arg0: i32) -> (i32, i32) {
    %c0_i32 = arith.constant 0 : i32
    %c0_i32_0 = arith.constant 0 : i32
    %c0_i32_1 = arith.constant 0 : i32
    return %c0_i32, %c0_i32_0 : i32, i32
  }
  func.func @transform_3(%arg0: i32) -> (i32, i32) {
    %c0_i32 = arith.constant 0 : i32
    %c0_i32_0 = arith.constant 0 : i32
    %c0_i32_1 = arith.constant 0 : i32
    return %c0_i32, %c0_i32_0 : i32, i32
  }
  func.func @transform_4(%arg0: i32) -> (i32, i32) {
    %c0_i32 = arith.constant 0 : i32
    %c0_i32_0 = arith.constant 0 : i32
    %c0_i32_1 = arith.constant 0 : i32
    return %c0_i32, %c0_i32_0 : i32, i32
  }
  func.func @transform_5(%arg0: i32) -> (i32, i32) {
    %c0_i32 = arith.constant 0 : i32
    %c0_i32_0 = arith.constant 0 : i32
    %c0_i32_1 = arith.constant 0 : i32
    return %c0_i32, %c0_i32_0 : i32, i32
  }
  func.func @transform_6(%arg0: i32) -> (i32, i32) {
    %c0_i32 = arith.constant 0 : i32
    %c0_i32_0 = arith.constant 0 : i32
    %c0_i32_1 = arith.constant 0 : i32
    return %c0_i32, %c0_i32_0 : i32, i32
  }
  func.func @transform_7(%arg0: i32) -> (i32, i32) {
    %c0_i32 = arith.constant 0 : i32
    %c0_i32_0 = arith.constant 0 : i32
    return %arg0, %c0_i32 : i32, i32
  }
}

</mosaic_0001>

<bundles_post_ra>
// kernel: dqn_forward.1
= control target key start
LH: loop header
LB: loop body
LE: loop exit
PB: predicated region body
PF: predicated region fallthrough
CT: control target
= control target key end

     0   :  { %12 = vsyncpa [#allocation3], 0  ;;  %s704_s0 = inlined_call_operand.vmem [shape: f32[8,8], index: 0, kind: input, shape index: {}]   ;;  %s705_s1 = inlined_call_operand.vmem [shape: f32[8,128], index: 1, kind: input, shape index: {}]   ;;  %s706_s2 = inlined_call_operand.vmem [shape: f32[1,128], index: 2, kind: input, shape index: {}]   ;;  %s707_s3 = inlined_call_operand.hbm [shape: f32[128,128], index: 3, kind: input, shape index: {}]   ;;  %s708_s4 = inlined_call_operand.vmem [shape: f32[1,128], index: 4, kind: input, shape index: {}]   ;;  %s709_s5 = inlined_call_operand.hbm [shape: f32[128,128], index: 5, kind: input, shape index: {}]   ;;  %s710_s6 = inlined_call_operand.vmem [shape: f32[1,128], index: 6, kind: input, shape index: {}]   ;;  %s711_s7 = inlined_call_operand.hbm [shape: f32[8,128], index: 7, kind: output, shape index: {}]  }
   0x1   :  { %13 = vsyncpa [#allocation6], 0 }
   0x2   :  { %14 = vsyncpa [#allocation4], 0  ;;  %s586_s24 = smov [#allocation2]   ;;  %s514_s28 = scalar_lea.hbm %s707_s3, 2048 }
   0x3   :  { %s26_s25 = sshll.u32 %s586_s24, 4  ;;  %p515_p0 = scmp.ne.s32.totalorder %s707_s3, %s514_s28  ;;  %s27_s25 = int_to_ptr.vmem [resolvable:$true] %s26_s25 }
   0x4   :  { %p518_p1 = scmp.lt.u32.totalorder %s514_s28, %s707_s3 }
   0x6   :  { %p520_p2 = pnand %p518_p1, %p515_p0 }
   0x8   :  { %523 = shalt.err (!%p520_p2)
}
   0x9   :  { %s524_s10 = scalar_lea.vmem %s27_s25, 2048  ;;  %p529_p4 = scmp.lt.s32.totalorder %s27_s25, %s27_s25 }
   0xa   :  { %p525_p3 = scmp.ne.s32.totalorder %s27_s25, %s524_s10  ;;  %p530_p5 = scmp.lt.s32.totalorder %s524_s10, %s524_s10 }
   0xc   :  { %p531_p6 = por %p530_p5, %p529_p4 }
   0xe   :  { %p532_p7 = pnand %p531_p6, %p525_p3 }
  0x10   :  { %535 = shalt.err (!%p532_p7)
}
  0x11   :  { %s587_s11 = smov 128   ;;  %s588_s12 = smov 8  }
  0x12   :  { %32 = dma.hbm_to_vmem [thread:$0]  %s707_s3, 2048, %s27_s25, [#allocation3], %s587_s11, %s587_s11, %s588_s12  }
  0x13   :  { %s589_s15 = smov [#allocation5]   ;;  %s536_s19 = scalar_lea.hbm %s709_s5, 2048 }
  0x14   :  { %s40_s16 = sshll.u32 %s589_s15, 4  ;;  %p537_p8 = scmp.ne.s32.totalorder %s709_s5, %s536_s19  ;;  %s41_s16 = int_to_ptr.vmem [resolvable:$true] %s40_s16 }
  0x15   :  { %p540_p9 = scmp.lt.u32.totalorder %s536_s19, %s709_s5 }
  0x17   :  { %p542_p10 = pnand %p540_p9, %p537_p8 }
  0x19   :  { %545 = shalt.err (!%p542_p10)
}
  0x1a   :  { %s546_s24 = scalar_lea.vmem %s41_s16, 2048  ;;  %p551_p12 = scmp.lt.s32.totalorder %s41_s16, %s41_s16 }
  0x1b   :  { %p547_p11 = scmp.ne.s32.totalorder %s41_s16, %s546_s24  ;;  %p552_p13 = scmp.lt.s32.totalorder %s546_s24, %s546_s24 }
  0x1d   :  { %p553_p0 = por %p552_p13, %p551_p12 }
  0x1f   :  { %p554_p1 = pnand %p553_p0, %p547_p11 }
  0x21   :  { %557 = shalt.err (!%p554_p1)
}
  0x22   :  { %46 = dma.hbm_to_vmem [thread:$0]  %s709_s5, 2048, %s41_s16, [#allocation6], %s587_s11, %s587_s11, %s588_s12  }
  0x23   :  { %580 = dma.done.wait [#allocation3], 2048  }
  0x24   :  { %581 = vsyncadd [#allocation3], 4294965248 }
  0x25   :  { %582 = dma.done.wait [#allocation6], 2048  }
  0x26   :  { %583 = vsyncadd [#allocation6], 4294965248  ;;  %v590_v0 = vmov 0.0   ;;  %vm591_vm0 = vmmov 0   ;;  %v592_v1 = vmov 0.0|0.0   ;;  %vm64_vm1 = vcmask 64512  }
  0x27   :  { %383 = vmatprep.subr.mxu0 %v590_v0  ;;  %385 = vmatprep.mubr.msk.f32.mxu0 %vm591_vm0, %v590_v0  ;;  %v56_v2 = vld [vmem:[%s705_s1] sm:$0xff]  ;;  %v140_v5 = vld [vmem:[#allocation2 + $0x8] sm:$0xff]  ;;  %v141_v6 = vld [vmem:[#allocation2 + $0x10] sm:$0xff]  ;;  %s593_s9 = smov [#allocation7]  }
  0x28   :  { %458 = vmatprep.subr.bf16.mxu1 %v592_v1  ;;  %420 = vmatprep.mubr.msk.f32.mxu1 %vm591_vm0, %v590_v0  ;;  %v55_v3 = vld [vmem:[%s704_s0] sm:$0xff]  ;;  %v142_v7 = vld [vmem:[#allocation2 + $0x18] sm:$0xff]  ;;  %v144_v11 = vld [vmem:[#allocation2 + $0x28] sm:$0xff]  ;;  %s333_s10 = sshll.u32 %s593_s9, 4  ;;  %s334_s10 = int_to_ptr.vmem [resolvable:$true] %s333_s10 }
  0x29   :  { %v139_v4 = vld [vmem:[#allocation2] sm:$0xff]  ;;  %384 = vmatpush3.msra.mxu0 %v56_v2  ;;  %v462_v9 = vpack.c.bf16 %v142_v7, %v141_v6  ;;  %v145_v13 = vld [vmem:[#allocation2 + $0x30] sm:$0xff]  ;;  %v146_v14 = vld [vmem:[#allocation2 + $0x38] sm:$0xff]  ;;  %s558_s11 = scalar_lea.vmem %s334_s10, 128  ;;  %p563_p3 = scmp.lt.s32.totalorder %s334_s10, %s334_s10 }
  0x2a   :  { %386 = vmatmul.mubr.msk.f32.vlgmr.msra.gmra.mrb[0].mxu0 %vm64_vm1, %v55_v3  ;;  %v459_v8 = vpack.c.bf16 %v140_v5, %v139_v4  ;;  %482 = vmatprep.subr.bf16.mxu0 %v592_v1  ;;  %v143_v10 = vld [vmem:[#allocation2 + $0x20] sm:$0xff]  ;;  %v468_v15 = vpack.c.bf16 %v146_v14, %v145_v13  ;;  %v148_v17 = vld [vmem:[#allocation2 + $0x48] sm:$0xff]  ;;  %v149_v19 = vld [vmem:[#allocation2 + $0x50] sm:$0xff]  ;;  %p559_p2 = scmp.ne.s32.totalorder %s334_s10, %s558_s11  ;;  %p564_p4 = scmp.lt.s32.totalorder %s558_s11, %s558_s11 }
  0x2b   :  { %455 = vmatprep.mubr.msk.f32.mxu0 %vm591_vm0, %v590_v0  ;;  %v465_v12 = vpack.c.bf16 %v144_v11, %v143_v10  ;;  %v147_v16 = vld [vmem:[#allocation2 + $0x40] sm:$0xff]  ;;  %v150_v20 = vld [vmem:[#allocation2 + $0x58] sm:$0xff]  ;;  %v152_v23 = vld [vmem:[#allocation2 + $0x68] sm:$0xff] }
  0x2c   :  { %460 = vmatpush3.bf16.msra.mxu1 %v459_v8  ;;  %v471_v18 = vpack.c.bf16 %v148_v17, %v147_v16  ;;  %v474_v21 = vpack.c.bf16 %v150_v20, %v149_v19  ;;  %v151_v22 = vld [vmem:[#allocation2 + $0x60] sm:$0xff]  ;;  %v153_v25 = vld [vmem:[#allocation2 + $0x70] sm:$0xff]  ;;  %v154_v26 = vld [vmem:[#allocation2 + $0x78] sm:$0xff]  ;;  %p565_p5 = por %p564_p4, %p563_p3 }
  0x2d   :  { %461 = vmatprep.subr.bf16.mxu1 %v592_v1  ;;  %v477_v24 = vpack.c.bf16 %v152_v23, %v151_v22  ;;  %v480_v27 = vpack.c.bf16 %v154_v26, %v153_v25  ;;  %v233_v28 = vld [vmem:[#allocation5] sm:$0xff]  ;;  %v234_v29 = vld [vmem:[#allocation5 + $0x8] sm:$0xff]  ;;  %v235_v30 = vld [vmem:[#allocation5 + $0x10] sm:$0xff] }
  0x2e   :  { %v483_v31 = vpack.c.bf16 %v234_v29, %v233_v28  ;;  %v236_v32 = vld [vmem:[#allocation5 + $0x18] sm:$0xff]  ;;  %v237_v34 = vld [vmem:[#allocation5 + $0x20] sm:$0xff]  ;;  %v238_v35 = vld [vmem:[#allocation5 + $0x28] sm:$0xff]  ;;  %p566_p6 = pnand %p565_p5, %p559_p2 }
  0x2f   :  { %v486_v33 = vpack.c.bf16 %v236_v32, %v235_v30  ;;  %v489_v36 = vpack.c.bf16 %v238_v35, %v237_v34  ;;  %v239_v37 = vld [vmem:[#allocation5 + $0x30] sm:$0xff]  ;;  %v240_v38 = vld [vmem:[#allocation5 + $0x38] sm:$0xff]  ;;  %v241_v40 = vld [vmem:[#allocation5 + $0x40] sm:$0xff] }
  0x30   :  { %463 = vmatpush3.bf16.msra.mxu1 %v462_v9  ;;  %484 = vmatpush3.bf16.msra.mxu0 %v483_v31  ;;  %v492_v39 = vpack.c.bf16 %v240_v38, %v239_v37  ;;  %v242_v41 = vld [vmem:[#allocation5 + $0x48] sm:$0xff]  ;;  %v243_v43 = vld [vmem:[#allocation5 + $0x50] sm:$0xff]  ;;  %v244_v44 = vld [vmem:[#allocation5 + $0x58] sm:$0xff] }
  0x31   :  { %464 = vmatprep.subr.bf16.mxu1 %v592_v1  ;;  %485 = vmatprep.subr.bf16.mxu0 %v592_v1  ;;  %v495_v42 = vpack.c.bf16 %v242_v41, %v241_v40  ;;  %v498_v45 = vpack.c.bf16 %v244_v44, %v243_v43  ;;  %v245_v46 = vld [vmem:[#allocation5 + $0x60] sm:$0xff]  ;;  %v246_v47 = vld [vmem:[#allocation5 + $0x68] sm:$0xff]  ;;  %v247_v54 = vld [vmem:[#allocation5 + $0x70] sm:$0xff] }
  0x32   :  { %v501_v48 = vpack.c.bf16 %v246_v47, %v245_v46  ;;  %v343_v49 = vld [vmem:[%s706_s2] ss:$0 sm:$0xff]  ;;  %v248_v55 = vld [vmem:[#allocation5 + $0x78] sm:$0xff] }
  0x33   :  { %v504_v56 = vpack.c.bf16 %v248_v55, %v247_v54  ;;  %v345_v57 = vld [vmem:[%s708_s4] ss:$0 sm:$0xff] }
  0x34   :  { %466 = vmatpush3.bf16.msra.mxu1 %v465_v12  ;;  %487 = vmatpush3.bf16.msra.mxu0 %v486_v33  ;;  %v346_v62 = vld [vmem:[%s710_s6] ss:$0 sm:$0xff] }
  0x35   :  { %467 = vmatprep.subr.bf16.mxu1 %v592_v1  ;;  %488 = vmatprep.subr.bf16.mxu0 %v592_v1 }
  0x38   :  { %469 = vmatpush3.bf16.msra.mxu1 %v468_v15  ;;  %490 = vmatpush3.bf16.msra.mxu0 %v489_v36 }
  0x39   :  { %470 = vmatprep.subr.bf16.mxu1 %v592_v1  ;;  %491 = vmatprep.subr.bf16.mxu0 %v592_v1 }
  0x3c   :  { %472 = vmatpush3.bf16.msra.mxu1 %v471_v18  ;;  %493 = vmatpush3.bf16.msra.mxu0 %v492_v39 }
  0x3d   :  { %473 = vmatprep.subr.bf16.mxu1 %v592_v1  ;;  %494 = vmatprep.subr.bf16.mxu0 %v592_v1 }
  0x40   :  { %475 = vmatpush3.bf16.msra.mxu1 %v474_v21  ;;  %496 = vmatpush3.bf16.msra.mxu0 %v495_v42 }
  0x41   :  { %476 = vmatprep.subr.bf16.mxu1 %v592_v1  ;;  %497 = vmatprep.subr.bf16.mxu0 %v592_v1 }
  0x44   :  { %478 = vmatpush3.bf16.msra.mxu1 %v477_v24  ;;  %499 = vmatpush3.bf16.msra.mxu0 %v498_v45 }
  0x45   :  { %479 = vmatprep.subr.bf16.mxu1 %v592_v1  ;;  %500 = vmatprep.subr.bf16.mxu0 %v592_v1 }
  0x48   :  { %481 = vmatpush3.bf16.msra.mxu1 %v480_v27  ;;  %502 = vmatpush3.bf16.msra.mxu0 %v501_v48 }
  0x49   :  { %503 = vmatprep.subr.bf16.mxu0 %v592_v1 }
  0x4c   :  { %505 = vmatpush3.bf16.msra.mxu0 %v504_v56 }
  0xfd   :  { %v134_v50 = vpop.f32.mrb[0].mxu0 }
  0xfe   :  { %v135_v51 = vadd.f32 %v343_v49, %v134_v50  ;;  %v387_v52 = vpop.f32.mrb[1].mxu0 }
 0x100   :  { %v138_v53 = vmax.f32 %v135_v51, 0.0 }
 0x102   :  { %421 = vmatmul.mubr.f32.vlgmr.msra.gmra.mrb[0].mxu1 %v138_v53 }
 0x1d5   :  { %v228_v58 = vpop.f32.mrb[0].mxu1 }
 0x1d6   :  { %v229_v59 = vadd.f32 %v345_v57, %v228_v58  ;;  %v422_v60 = vpop.f32.mrb[1].mxu1 }
 0x1d8   :  { %v232_v61 = vmax.f32 %v229_v59, 0.0 }
 0x1da   :  { %456 = vmatmul.mubr.f32.vlgmr.msra.gmra.mrb[2].mxu0 %v232_v61 }
 0x2ad   :  { %v322_v63 = vpop.f32.mrb[2].mxu0 }
 0x2ae   :  { %v323_v0 = vadd.f32 %v346_v62, %v322_v63  ;;  %v457_v1 = vpop.f32.mrb[3].mxu0 }
 0x2b0   :  { %326 = vst [vmem:[#allocation7] sm:$0xff] %v323_v0 }
 0x2b1   :  { %569 = shalt.err (!%p566_p6)
}
 0x2b2   :  { %s570_s13 = scalar_lea.hbm %s711_s7, 128 }
 0x2b3   :  { %p571_p7 = scmp.ne.s32.totalorder %s711_s7, %s570_s13  ;;  %p574_p8 = scmp.lt.u32.totalorder %s570_s13, %s711_s7 }
 0x2b5   :  { %p576_p9 = pnand %p574_p8, %p571_p7 }
 0x2b7   :  { %579 = shalt.err (!%p576_p9)
}
 0x2b8   :  { %336 = dma.vmem_to_hbm [thread:$0]  %s334_s10, 128, %s711_s7, [#allocation4]  }
 0x2b9   :  { %584 = dma.done.wait [#allocation4], 128  }
 0x2ba   :  { %585 = vsyncadd [#allocation4], 4294967168 }
 0x2bb   :  { %340 = vsyncpa [#allocation3], 1 }
 0x2bc   :  { %341 = vsyncpa [#allocation6], 1 }
 0x2bd   :  { %342 = vsyncpa [#allocation4], 1 }

</bundles_post_ra>
